<compile_context>
chip_gen: v7x
topology: tpu7x:2x2x1
jax: 0.10.0
libtpu: 0.0.40
codegen_flags: <defaults>
</compile_context>

<pallas_src>
import functools

import jax
import jax.numpy as jnp
from jax.experimental import pallas as pl
from jax.experimental.pallas import tpu as pltpu

_LANES = 128
_TARGET_BLOCK_ROWS = 8192   # 8192 x 128 x 4B = 4 MiB per f32 input block


def _tensorcores_per_chip():
    """Best-effort TensorCores/chip (2 on v7x, 1 on v5e/v6e). Defaults to 1."""
    try:
        info = pltpu.get_tpu_info()
    except Exception:
        return 1
    # Only trust attributes that explicitly name TensorCores (avoid picking up
    # SparseCore counts); anything else falls back to the safe single-TC path.
    for attr in ("num_tensorcores", "tensorcores_per_chip", "num_tensor_cores",
                 "tensor_cores_per_chip"):
        v = getattr(info, attr, None)
        if isinstance(v, int) and v >= 1:
            return v
    return 1


def _iou_partial_kernel(pred_ref, target_ref, out_ref, acc_pt_ref, acc_sum_ref,
                        *, rows, block_rows, blocks_per_split, n_splits,
                        mask_tail, vreg_acc):
    c = pl.program_id(0)   # TensorCore split ("parallel"; size 1 on v5e/v6e)
    k = pl.program_id(1)   # reduction steps within the split ("arbitrary")

    @pl.when(k == 0)
    def _():
        acc_pt_ref[...] = jnp.zeros_like(acc_pt_ref)
        acc_sum_ref[...] = jnp.zeros_like(acc_sum_ref)

    p = pred_ref[...].astype(jnp.float32)
    t = target_ref[...].astype(jnp.float32)
    pt = p * t
    ps = p + t

    def accumulate(pt_v, ps_v):
        if vreg_acc:
            # Fold the block into a single (8, 128) vreg: sublane-split reshape
            # keeps (8, 128) tiles intact, the leading-axis sum is VALU-only.
            pt_v = pt_v.reshape(block_rows // 8, 8, _LANES).sum(axis=0)
            ps_v = ps_v.reshape(block_rows // 8, 8, _LANES).sum(axis=0)
        acc_pt_ref[...] += pt_v
        acc_sum_ref[...] += ps_v

    if mask_tail:
        # Only the very last block of the last split can be partial; every
        # other step takes the unmasked fast path.
        last_block = (c == n_splits - 1) & (k == blocks_per_split - 1)

        @pl.when(last_block)
        def _():
            row_start = (c * blocks_per_split + k) * block_rows
            row_ids = jax.lax.broadcasted_iota(
                jnp.int32, (block_rows, _LANES), 0) + row_start
            valid = row_ids < rows
            accumulate(jnp.where(valid, pt, 0.0), jnp.where(valid, ps, 0.0))

        @pl.when(jnp.logical_not(last_block))
        def _():
            accumulate(pt, ps)
    else:
        accumulate(pt, ps)

    @pl.when(k == pl.num_programs(1) - 1)
    def _():
        out_ref[0, 0] = jnp.sum(acc_pt_ref[...])   # intersection partial
        out_ref[0, 1] = jnp.sum(acc_sum_ref[...])  # sum(pred)+sum(target) partial


def iou_loss(pred, target, smooth=1e-6):
    pred_flat = jnp.ravel(pred)
    target_flat = jnp.ravel(target)
    n = pred_flat.shape[0]

    rows = n // _LANES
    kernel_elems = rows * _LANES

    # <128-element remainder: reduce in plain JAX instead of padding / copying
    # both inputs in HBM just to make them rectangular.
    if kernel_elems < n:
        p_tail = pred_flat[kernel_elems:].astype(jnp.float32)
        t_tail = target_flat[kernel_elems:].astype(jnp.float32)
        tail_inter = jnp.sum(p_tail * t_tail)
        tail_total = jnp.sum(p_tail) + jnp.sum(t_tail)
    else:
        tail_inter = jnp.float32(0.0)
        tail_total = jnp.float32(0.0)

    if rows == 0:
        # Too small to form a single (rows, 128) tile: pure-JAX fallback.
        intersection = tail_inter
        total = tail_total
    else:
        # Inputs stay in their native dtype; the f32 upcast happens in-kernel.
        pred2d = pred_flat[:kernel_elems].reshape(rows, _LANES)
        target2d = target_flat[:kernel_elems].reshape(rows, _LANES)

        block_rows = min(_TARGET_BLOCK_ROWS, rows)
        num_blocks = pl.cdiv(rows, block_rows)

        # 2-way "parallel" split only where it maps onto two TensorCores (v7x)
        # and never generates a fully out-of-bounds block.
        if _tensorcores_per_chip() >= 2 and num_blocks >= 2 and num_blocks % 2 == 0:
            n_splits = 2
        else:
            n_splits = 1
        blocks_per_split = num_blocks // n_splits

        mask_tail = (num_blocks * block_rows) != rows
        vreg_acc = (block_rows % 8) == 0          # False only for tiny single-block inputs
        acc_rows = 8 if vreg_acc else block_rows

        kernel = functools.partial(
            _iou_partial_kernel,
            rows=rows,
            block_rows=block_rows,
            blocks_per_split=blocks_per_split,
            n_splits=n_splits,
            mask_tail=mask_tail,
            vreg_acc=vreg_acc,
        )

        def in_map(c, k):
            return (c * blocks_per_split + k, 0)

        # Explicit VMEM budget: 2 inputs x 2 buffers + full-block f32
        # temporaries + slack.  Above v5e's 16 MiB default scoped limit,
        # comfortably below v7x's 64 MiB per-TC VMEM.
        in_bytes = block_rows * _LANES * (
            pred2d.dtype.itemsize + target2d.dtype.itemsize)
        vmem_limit = int(min(96 * 1024 * 1024,
                             max(32 * 1024 * 1024, 4 * in_bytes + (8 << 20))))

        partials = pl.pallas_call(
            kernel,
            out_shape=jax.ShapeDtypeStruct((n_splits, 2), jnp.float32),
            grid_spec=pltpu.PrefetchScalarGridSpec(
                num_scalar_prefetch=0,
                grid=(n_splits, blocks_per_split),
                in_specs=[
                    pl.BlockSpec((block_rows, _LANES), in_map),
                    pl.BlockSpec((block_rows, _LANES), in_map),
                ],
                out_specs=pl.BlockSpec((1, 2), lambda c, k: (c, 0),
                                       memory_space=pltpu.SMEM),
                scratch_shapes=[
                    pltpu.VMEM((acc_rows, _LANES), jnp.float32),
                    pltpu.VMEM((acc_rows, _LANES), jnp.float32),
                ],
            ),
            compiler_params=pltpu.CompilerParams(
                dimension_semantics=("parallel", "arbitrary"),
                vmem_limit_bytes=vmem_limit,
            ),
        )(pred2d, target2d)

        intersection = jnp.sum(partials[:, 0]) + tail_inter
        total = jnp.sum(partials[:, 1]) + tail_total

    union = total - intersection
    iou = (intersection + smooth) / (union + smooth)
    return 1.0 - iou


if __name__ == "__main__":
    key = jax.random.PRNGKey(0)
    k1, k2 = jax.random.split(key)
    # Segmentation-style inputs: NCHW
    pred = jax.nn.sigmoid(jax.random.normal(k1, (2, 4, 16, 16), jnp.float32))
    target = (jax.random.uniform(k2, (2, 4, 16, 16)) > 0.5).astype(jnp.float32)

    loss = iou_loss(pred, target)
    jax.block_until_ready(loss)

    # Pure-JAX reference check
    p = pred.reshape(-1)
    t = target.reshape(-1)
    inter = jnp.sum(p * t)
    union = jnp.sum(p) + jnp.sum(t) - inter
    ref = 1.0 - (inter + 1e-6) / (union + 1e-6)
    assert jnp.allclose(loss, ref, atol=1e-5, rtol=1e-5), (loss, ref)

    print("KERNEL_OK")
</pallas_src>

<mosaic_0001>
module attributes {stable_mosaic.version = 11 : i64} {
  func.func @_iou_partial_kernel(%arg0: i32, %arg1: i32, %arg2: memref<16x128xf32, #tpu.memory_space<vmem>>, %arg3: memref<16x128xf32, #tpu.memory_space<vmem>>, %arg4: memref<1x2xf32, #tpu.memory_space<smem>>, %arg5: memref<8x128xf32, #tpu.memory_space<vmem>>, %arg6: memref<8x128xf32, #tpu.memory_space<vmem>>) attributes {dimension_semantics = [#tpu.dimension_semantics<parallel>, #tpu.dimension_semantics<arbitrary>], iteration_bounds = array<i64: 1, 1>, scalar_prefetch = 0 : i64, scratch_operands = 2 : i64, tpu.core_type = #tpu.core_type<tc>, window_params = [{transform_indices = @transform_0, window_bounds = array<i64: 16, 128>}, {transform_indices = @transform_1, window_bounds = array<i64: 16, 128>}, {transform_indices = @transform_2, window_bounds = array<i64: 1, 2>}]} {
    %c0_i32 = arith.constant 0 : i32
    %0 = arith.cmpi eq, %arg1, %c0_i32 : i32
    %1 = arith.extui %0 : i1 to i32
    %c0_i32_0 = arith.constant 0 : i32
    %2 = arith.cmpi ne, %1, %c0_i32_0 : i32
    scf.if %2 {
      %cst_15 = arith.constant 0.000000e+00 : f32
      %20 = vector.broadcast %cst_15 : f32 to vector<8x128xf32>
      %c0_16 = arith.constant 0 : index
      %c0_17 = arith.constant 0 : index
      %21 = vector.load %arg5[%c0_16, %c0_17] : memref<8x128xf32, #tpu.memory_space<vmem>>, vector<8x128xf32>
      tpu.vector_store %arg5[%c0_16, %c0_17], %20 {strides = array<i32>} : memref<8x128xf32, #tpu.memory_space<vmem>>, vector<8x128xf32>,
      %cst_18 = arith.constant 0.000000e+00 : f32
      %22 = vector.broadcast %cst_18 : f32 to vector<8x128xf32>
      %c0_19 = arith.constant 0 : index
      %c0_20 = arith.constant 0 : index
      %23 = vector.load %arg6[%c0_19, %c0_20] : memref<8x128xf32, #tpu.memory_space<vmem>>, vector<8x128xf32>
      tpu.vector_store %arg6[%c0_19, %c0_20], %22 {strides = array<i32>} : memref<8x128xf32, #tpu.memory_space<vmem>>, vector<8x128xf32>,
    } else {
    }
    %c0 = arith.constant 0 : index
    %c0_1 = arith.constant 0 : index
    %3 = vector.load %arg2[%c0, %c0_1] : memref<16x128xf32, #tpu.memory_space<vmem>>, vector<16x128xf32>
    %c0_2 = arith.constant 0 : index
    %c0_3 = arith.constant 0 : index
    %4 = vector.load %arg3[%c0_2, %c0_3] : memref<16x128xf32, #tpu.memory_space<vmem>>, vector<16x128xf32>
    %5 = arith.mulf %3, %4 : vector<16x128xf32>
    %6 = arith.addf %3, %4 : vector<16x128xf32>
    %7 = vector.shape_cast %5 : vector<16x128xf32> to vector<2x8x128xf32>
    %cst = arith.constant dense<0.000000e+00> : vector<8x128xf32>
    %8 = vector.multi_reduction <add>, %7, %cst [0] : vector<2x8x128xf32> to vector<8x128xf32>
    %9 = vector.shape_cast %6 : vector<16x128xf32> to vector<2x8x128xf32>
    %cst_4 = arith.constant dense<0.000000e+00> : vector<8x128xf32>
    %10 = vector.multi_reduction <add>, %9, %cst_4 [0] : vector<2x8x128xf32> to vector<8x128xf32>
    %c0_5 = arith.constant 0 : index
    %c0_6 = arith.constant 0 : index
    %11 = vector.load %arg5[%c0_5, %c0_6] : memref<8x128xf32, #tpu.memory_space<vmem>>, vector<8x128xf32>
    %12 = arith.addf %11, %8 : vector<8x128xf32>
    %c0_7 = arith.constant 0 : index
    %c0_8 = arith.constant 0 : index
    %13 = vector.load %arg5[%c0_7, %c0_8] : memref<8x128xf32, #tpu.memory_space<vmem>>, vector<8x128xf32>
    tpu.vector_store %arg5[%c0_7, %c0_8], %12 {strides = array<i32>} : memref<8x128xf32, #tpu.memory_space<vmem>>, vector<8x128xf32>,
    %c0_9 = arith.constant 0 : index
    %c0_10 = arith.constant 0 : index
    %14 = vector.load %arg6[%c0_9, %c0_10] : memref<8x128xf32, #tpu.memory_space<vmem>>, vector<8x128xf32>
    %15 = arith.addf %14, %10 : vector<8x128xf32>
    %c0_11 = arith.constant 0 : index
    %c0_12 = arith.constant 0 : index
    %16 = vector.load %arg6[%c0_11, %c0_12] : memref<8x128xf32, #tpu.memory_space<vmem>>, vector<8x128xf32>
    tpu.vector_store %arg6[%c0_11, %c0_12], %15 {strides = array<i32>} : memref<8x128xf32, #tpu.memory_space<vmem>>, vector<8x128xf32>,
    %c0_i32_13 = arith.constant 0 : i32
    %17 = arith.cmpi eq, %arg1, %c0_i32_13 : i32
    %18 = arith.extui %17 : i1 to i32
    %c0_i32_14 = arith.constant 0 : i32
    %19 = arith.cmpi ne, %18, %c0_i32_14 : i32
    scf.if %19 {
      %c0_15 = arith.constant 0 : index
      %c0_16 = arith.constant 0 : index
      %20 = vector.load %arg5[%c0_15, %c0_16] : memref<8x128xf32, #tpu.memory_space<vmem>>, vector<8x128xf32>
      %21 = vector.shape_cast %20 : vector<8x128xf32> to vector<1x8x128xf32>
      %cst_17 = arith.constant dense<0.000000e+00> : vector<1xf32>
      %22 = vector.multi_reduction <add>, %21, %cst_17 [1, 2] : vector<1x8x128xf32> to vector<1xf32>
      %23 = vector.shape_cast %22 : vector<1xf32> to vector<1x1x1xf32>
      %24 = vector.extract %23[0, 0, 0] : f32 from vector<1x1x1xf32>
      %c0_18 = arith.constant 0 : index
      %c0_19 = arith.constant 0 : index
      %25 = memref.load %arg4[%c0_18, %c0_19] : memref<1x2xf32, #tpu.memory_space<smem>>
      memref.store %24, %arg4[%c0_18, %c0_19] : memref<1x2xf32, #tpu.memory_space<smem>>
      %c0_20 = arith.constant 0 : index
      %c0_21 = arith.constant 0 : index
      %26 = vector.load %arg6[%c0_20, %c0_21] : memref<8x128xf32, #tpu.memory_space<vmem>>, vector<8x128xf32>
      %27 = vector.shape_cast %26 : vector<8x128xf32> to vector<1x8x128xf32>
      %cst_22 = arith.constant dense<0.000000e+00> : vector<1xf32>
      %28 = vector.multi_reduction <add>, %27, %cst_22 [1, 2] : vector<1x8x128xf32> to vector<1xf32>
      %29 = vector.shape_cast %28 : vector<1xf32> to vector<1x1x1xf32>
      %30 = vector.extract %29[0, 0, 0] : f32 from vector<1x1x1xf32>
      %c0_23 = arith.constant 0 : index
      %c1 = arith.constant 1 : index
      %31 = memref.load %arg4[%c0_23, %c1] : memref<1x2xf32, #tpu.memory_space<smem>>
      memref.store %30, %arg4[%c0_23, %c1] : memref<1x2xf32, #tpu.memory_space<smem>>
    } else {
    }
    return
  }
  func.func @transform_0(%arg0: i32, %arg1: i32) -> (i32, i32) {
    %c1_i32 = arith.constant 1 : i32
    %0 = arith.muli %arg0, %c1_i32 : i32
    %1 = arith.addi %0, %arg1 : i32
    %c0_i32 = arith.constant 0 : i32
    %c0_i32_0 = arith.constant 0 : i32
    return %1, %c0_i32 : i32, i32
  }
  func.func @transform_1(%arg0: i32, %arg1: i32) -> (i32, i32) {
    %c1_i32 = arith.constant 1 : i32
    %0 = arith.muli %arg0, %c1_i32 : i32
    %1 = arith.addi %0, %arg1 : i32
    %c0_i32 = arith.constant 0 : i32
    %c0_i32_0 = arith.constant 0 : i32
    return %1, %c0_i32 : i32, i32
  }
  func.func @transform_2(%arg0: i32, %arg1: i32) -> (i32, i32) {
    %c0_i32 = arith.constant 0 : i32
    %c0_i32_0 = arith.constant 0 : i32
    return %arg0, %c0_i32 : i32, i32
  }
}

</mosaic_0001>

<bundles_post_ra>
// kernel: tpu_custom_call.1
= control target key start
LH: loop header
LB: loop body
LE: loop exit
PB: predicated region body
PF: predicated region fallthrough
CT: control target
= control target key end

     0   :  { %7 = vsyncpa [#allocation5], 0  ;;  %s241_s0 = inlined_call_operand.hbm [shape: f32[16,128], index: 0, kind: input, shape index: {}]   ;;  %s242_s1 = inlined_call_operand.hbm [shape: f32[16,128], index: 1, kind: input, shape index: {}]   ;;  %s243_s2 = inlined_call_operand.hbm [shape: f32[1,2], index: 2, kind: output, shape index: {}]  }
   0x1   :  { %8 = vsyncpa [#allocation8], 0 }
   0x2   :  { %9 = vsyncpa [#allocation6], 0  ;;  %s185_s9 = smov [#allocation4]   ;;  %s125_s13 = scalar_lea.hbm %s241_s0, 256 }
   0x3   :  { %s19_s10 = sshll.u32 %s185_s9, 4  ;;  %p126_p0 = scmp.ne.s32.totalorder %s241_s0, %s125_s13  ;;  %s20_s10 = int_to_ptr.vmem [resolvable:$true] %s19_s10 }
   0x4   :  { %p129_p1 = scmp.lt.u32.totalorder %s125_s13, %s241_s0 }
   0x6   :  { %p131_p2 = pnand %p129_p1, %p126_p0 }
   0x8   :  { %134 = shalt.err (!%p131_p2)
}
   0x9   :  { %s135_s18 = scalar_lea.vmem %s20_s10, 256  ;;  %p140_p4 = scmp.lt.s32.totalorder %s20_s10, %s20_s10 }
   0xa   :  { %p136_p3 = scmp.ne.s32.totalorder %s20_s10, %s135_s18  ;;  %p141_p5 = scmp.lt.s32.totalorder %s135_s18, %s135_s18 }
   0xc   :  { %p142_p6 = por %p141_p5, %p140_p4 }
   0xe   :  { %p143_p7 = pnand %p142_p6, %p136_p3 }
  0x10   :  { %146 = shalt.err (!%p143_p7)
}
  0x11   :  { %s186_s19 = smov 128   ;;  %s187_s20 = smov 8  }
  0x12   :  { %25 = dma.hbm_to_vmem [thread:$0]  %s241_s0, 256, %s20_s10, [#allocation5], %s186_s19, %s186_s19, %s187_s20  }
  0x13   :  { %s188_s23 = smov [#allocation7]   ;;  %s147_s27 = scalar_lea.hbm %s242_s1, 256 }
  0x14   :  { %s35_s24 = sshll.u32 %s188_s23, 4  ;;  %p148_p8 = scmp.ne.s32.totalorder %s242_s1, %s147_s27  ;;  %s36_s24 = int_to_ptr.vmem [resolvable:$true] %s35_s24 }
  0x15   :  { %p151_p9 = scmp.lt.u32.totalorder %s147_s27, %s242_s1 }
  0x17   :  { %p153_p10 = pnand %p151_p9, %p148_p8 }
  0x19   :  { %156 = shalt.err (!%p153_p10)
}
  0x1a   :  { %s157_s4 = scalar_lea.vmem %s36_s24, 256  ;;  %p162_p12 = scmp.lt.s32.totalorder %s36_s24, %s36_s24 }
  0x1b   :  { %p158_p11 = scmp.ne.s32.totalorder %s36_s24, %s157_s4  ;;  %p163_p13 = scmp.lt.s32.totalorder %s157_s4, %s157_s4 }
  0x1d   :  { %p164_p0 = por %p163_p13, %p162_p12 }
  0x1f   :  { %p165_p1 = pnand %p164_p0, %p158_p11 }
  0x21   :  { %168 = shalt.err (!%p165_p1)
}
  0x22   :  { %41 = dma.hbm_to_vmem [thread:$0]  %s242_s1, 256, %s36_s24, [#allocation8], %s186_s19, %s186_s19, %s187_s20  }
  0x23   :  { %179 = dma.done.wait [#allocation5], 256  }
  0x24   :  { %180 = vsyncadd [#allocation5], 4294967040 }
  0x25   :  { %181 = dma.done.wait [#allocation8], 256  }
  0x26   :  { %182 = vsyncadd [#allocation8], 4294967040  ;;  %v58_v0 = vld [vmem:[#allocation4] sm:$0xff]  ;;  %v59_v1 = vld [vmem:[#allocation4 + $0x8] sm:$0xff]  ;;  %s169_s9 = scalar_lea.hbm %s243_s2, 16 }
  0x27   :  { %v60_v2 = vld [vmem:[#allocation7] sm:$0xff]  ;;  %v61_v3 = vld [vmem:[#allocation7 + $0x8] sm:$0xff]  ;;  %p170_p2 = scmp.ne.s32.totalorder %s243_s2, %s169_s9  ;;  %p173_p3 = scmp.lt.u32.totalorder %s169_s9, %s243_s2 }
  0x28   :  { %v62_v4 = vmul.f32 %v60_v2, %v58_v0  ;;  %v63_v5 = vmul.f32 %v61_v3, %v59_v1  ;;  %v64_v6 = vadd.f32 %v60_v2, %v58_v0  ;;  %v65_v7 = vadd.f32 %v61_v3, %v59_v1 }
  0x29   :  { %p175_p4 = pnand %p173_p3, %p170_p2 }
  0x2a   :  { %v66_v8 = vadd.f32 %v63_v5, %v62_v4  ;;  %v67_v9 = vadd.f32 %v65_v7, %v64_v6 }
  0x2c   :  { %78 = vadd.xlane.f32.xlu0 %v66_v8 }
  0x30   :  { %90 = vadd.xlane.f32.xlu0 %v67_v9 }
  0xb9   :  { %v79_v10 = vpop.xlane.xlu0 %78 }
  0xba   :  { %v80_v11 = vrot.slane %v79_v10, 4 }
  0xbc   :  { %v81_v12 = vadd.f32 %v80_v11, %v79_v10 }
  0xbd   :  { %v91_v13 = vpop.xlane.xlu0 %90 }
  0xbe   :  { %v82_v14 = vrot.slane %v81_v12, 2  ;;  %v92_v15 = vrot.slane %v91_v13, 4 }
  0xc0   :  { %v93_v16 = vadd.f32 %v92_v15, %v91_v13  ;;  %v83_v17 = vadd.f32 %v82_v14, %v81_v12 }
  0xc2   :  { %v94_v18 = vrot.slane %v93_v16, 2  ;;  %v84_v19 = vrot.slane %v83_v17, 1 }
  0xc4   :  { %v95_v20 = vadd.f32 %v94_v18, %v93_v16  ;;  %v85_v21 = vadd.f32 %v84_v19, %v83_v17 }
  0xc6   :  { %116 = vpush %v85_v21  ;;  %v96_v22 = vrot.slane %v95_v20, 1 }
  0xc8   :  { %v97_v23 = vadd.f32 %v96_v22, %v95_v20 }
  0xca   :  { %118 = vpush %v97_v23 }
  0xf7   :  { %s117_s1 = spop %116 }
  0xf8   :  { %88 = sst [smem:[#allocation9]] %s117_s1 }
  0xfb   :  { %s119_s6 = spop %118 }
  0xfc   :  { %100 = sst [smem:[#allocation9 + $0x1]] %s119_s6 }
  0xfd   :  { %178 = shalt.err (!%p175_p4)
}
  0xfe   :  { %s189_s14 = smov [#allocation9]  }
  0xff   :  { %108 = dma.smem_to_hbm %s189_s14, 16, %s243_s2, [#allocation6]  }
 0x100   :  { %183 = dma.done.wait [#allocation6], 16  }
 0x101   :  { %184 = vsyncadd [#allocation6], 4294967280 }
 0x102   :  { %112 = sfence }
 0x103   :  { %113 = vsyncpa [#allocation5], 1 }
 0x104   :  { %114 = vsyncpa [#allocation8], 1 }
 0x105   :  { %115 = vsyncpa [#allocation6], 1 }

</bundles_post_ra>
